<compile_context>
chip_gen: v7x
topology: tpu7x:2x2x1
jax: 0.10.0
libtpu: 0.0.40
codegen_flags: <defaults>
</compile_context>

<pallas_src>
import functools

import jax
import jax.numpy as jnp
from jax.experimental import pallas as pl
from jax.experimental.pallas import tpu as pltpu

LANE = 128          # lane width: pad all matmul lane / contraction dims to this
SUBLANE_BF16 = 16   # bf16 packs 16 sublanes per vreg


def _round_up(n, m):
    return ((n + m - 1) // m) * m


def _pad2d(x, rows, cols):
    r, c = x.shape
    return jnp.pad(x, ((0, rows - r), (0, cols - c)))


# ---------------- fused Pallas kernel ----------------

def make_fused_gcn_kernel(conv_dims_padded, n_class):
    """conv_dims_padded: (f_in_pad, f_out_pad) per conv layer (PADDED dims -> the
    (A@X)@W reassociation only fires when it saves MXU work on the real padded shapes).
    n_class: true class count (padded class lanes are masked out of log_softmax)."""

    def kernel(*refs):
        # refs: a, x, (w, b) * nconv, p, w_lin, b_lin, out
        a = refs[0][...]                      # [Np, Np] bf16, loaded once, reused 3x
        x = refs[1][...]                      # [Np, Fp] bf16 activation, stays on-chip
        idx = 2
        for (fi_p, fo_p) in conv_dims_padded:
            w = refs[idx][...]                # [fi_p, fo_p] bf16
            b = refs[idx + 1][...]            # [1, fo_p]    f32
            idx += 2
            if fi_p < fo_p:
                # (A @ X) @ W: fewer Np^2-scaled FLOPs when padded F_in < padded F_out.
                ax = jnp.dot(a, x, preferred_element_type=jnp.float32).astype(jnp.bfloat16)
                h = jnp.dot(ax, w, preferred_element_type=jnp.float32)
            else:
                # A @ (X @ W): standard order (identical MXU work when fi_p == fo_p).
                xw = jnp.dot(x, w, preferred_element_type=jnp.float32).astype(jnp.bfloat16)
                h = jnp.dot(a, xw, preferred_element_type=jnp.float32)
            # bias + Identity norm (net_norm='none') + ReLU, back to bf16
            x = jnp.maximum(h + b, 0.0).astype(jnp.bfloat16)

        p = refs[idx][...]                    # [Gp, Np]  bf16 mean-pool matrix
        w_lin = refs[idx + 1][...]            # [Hp, Cp]  bf16
        b_lin = refs[idx + 2][...]            # [1, Cp]   f32
        o_ref = refs[idx + 3]                 # [Gp, Cp]  f32 lane-dense store

        pooled = jnp.dot(p, x, preferred_element_type=jnp.float32).astype(jnp.bfloat16)
        logits = jnp.dot(pooled, w_lin, preferred_element_type=jnp.float32) + b_lin

        # Mask padded class lanes; logits stay f32 so -1e30 is safe (no bf16 overflow).
        lane = jax.lax.broadcasted_iota(jnp.int32, logits.shape, 1)
        logits = jnp.where(lane < n_class, logits, -1e30)

        m = jnp.max(logits, axis=-1, keepdims=True)
        s = logits - m
        lse = jnp.log(jnp.sum(jnp.exp(s), axis=-1, keepdims=True))
        o_ref[...] = s - lse

    return kernel


# ---------------- forward: a single pallas_call on pre-padded operands ----------------

@functools.partial(jax.jit, static_argnames=("n_class", "n_graphs"))
def gcn_forward(a_p, x_p, conv_ws_p, conv_bs_p, p_p, lin_w_p, lin_b_p,
                *, n_class, n_graphs):
    """All operands are already padded + cast (done once at init), so per-call work
    is exactly one fused pallas_call plus a tiny output slice."""
    np_, fp = x_p.shape
    gp = p_p.shape[0]
    hp, cp = lin_w_p.shape
    conv_dims_padded = tuple((int(w.shape[0]), int(w.shape[1])) for w in conv_ws_p)

    operands = [a_p, x_p]
    for w, b in zip(conv_ws_p, conv_bs_p):
        operands += [w, b]
    operands += [p_p, lin_w_p, lin_b_p]

    # Advisory cost estimate so XLA can schedule neighbours around the custom call.
    flops = 0
    for (fi, fo) in conv_dims_padded:
        flops += 2 * np_ * np_ * min(fi, fo) + 2 * np_ * fi * fo
    flops += 2 * gp * np_ * hp + 2 * gp * hp * cp
    operand_bytes = sum(int(o.size) * o.dtype.itemsize for o in operands)
    out_bytes = gp * cp * 4
    cost = pl.CostEstimate(flops=flops,
                           transcendentals=gp * cp,
                           bytes_accessed=operand_bytes + out_bytes)

    # Resident VMEM footprint: operands + output + two f32 [Np, max-dim] intermediates.
    interm_bytes = 2 * np_ * max(fp, hp, cp) * 4
    vmem_limit = int(min(max(2 * (operand_bytes + out_bytes + interm_bytes), 4 << 20),
                         100 << 20))

    vmem = pl.BlockSpec(memory_space=pltpu.MemorySpace.VMEM)
    out_padded = pl.pallas_call(
        make_fused_gcn_kernel(conv_dims_padded, n_class),
        out_shape=jax.ShapeDtypeStruct((gp, cp), jnp.float32),
        in_specs=[vmem] * len(operands),
        out_specs=vmem,
        compiler_params=pltpu.CompilerParams(vmem_limit_bytes=vmem_limit),
        cost_estimate=cost,
        # No grid: the whole (tiny) problem is VMEM-resident.
    )(*operands)

    return out_padded[:n_graphs, :n_class]


# ---------------- one-time preparation (NOT per forward call) ----------------

def prepare_gcn_params(conv_ws, conv_bs, lin3_w, lin3_b):
    """Pad + cast static parameters once at init."""
    conv_ws_p, conv_bs_p = [], []
    for w, b in zip(conv_ws, conv_bs):
        fi = _round_up(w.shape[0], LANE)
        fo = _round_up(w.shape[1], LANE)
        conv_ws_p.append(_pad2d(w, fi, fo).astype(jnp.bfloat16))
        conv_bs_p.append(jnp.pad(b, (0, fo - b.shape[0])).reshape(1, -1).astype(jnp.float32))
    hp = _round_up(lin3_w.shape[0], LANE)
    cp = _round_up(lin3_w.shape[1], LANE)
    lin_w_p = _pad2d(lin3_w, hp, cp).astype(jnp.bfloat16)
    lin_b_p = jnp.pad(lin3_b, (0, cp - lin3_b.shape[0])).reshape(1, -1).astype(jnp.float32)
    return tuple(conv_ws_p), tuple(conv_bs_p), lin_w_p, lin_b_p


def build_normalized_adjacency_padded(key, n_nodes, n_edges, n_pad):
    """A_hat = D^-1/2 (A + I) D^-1/2 built directly at padded size in bf16.
    Padded rows/cols are exactly zero (invariant the fused kernel relies on)."""
    k1, k2 = jax.random.split(key)
    src = jax.random.randint(k1, (n_edges,), 0, n_nodes)
    dst = jax.random.randint(k2, (n_edges,), 0, n_nodes)
    a = jnp.zeros((n_nodes, n_nodes), jnp.float32).at[src, dst].set(1.0)
    a = jnp.maximum(a, a.T)                                     # undirected
    a = a.at[jnp.arange(n_nodes), jnp.arange(n_nodes)].set(0.0)
    a = a + jnp.eye(n_nodes, dtype=jnp.float32)                 # self loops
    deg = jnp.sum(a, axis=1)
    d_inv_sqrt = 1.0 / jnp.sqrt(deg)
    a_hat = d_inv_sqrt[:, None] * a * d_inv_sqrt[None, :]
    return _pad2d(a_hat, n_pad, n_pad).astype(jnp.bfloat16)


def build_mean_pool_matrix_padded(batch, n_graphs, g_pad, n_pad):
    """Mean-pool matrix built directly at padded size in bf16 (padded cols are zero)."""
    one_hot = (batch[None, :] == jnp.arange(n_graphs)[:, None]).astype(jnp.float32)
    counts = jnp.maximum(one_hot.sum(axis=1, keepdims=True), 1.0)
    return _pad2d(one_hot / counts, g_pad, n_pad).astype(jnp.bfloat16)


def pad_features(x, n_pad, f_pad):
    """Node features padded + cast once per batch (here: once in the demo)."""
    return _pad2d(x, n_pad, f_pad).astype(jnp.bfloat16)


def init_params(key, nfeat, nhid, nclass, nconvs):
    keys = jax.random.split(key, 2 * nconvs + 2)
    conv_ws, conv_bs = [], []
    fan_in = nfeat
    for i in range(nconvs):
        scale = 1.0 / jnp.sqrt(float(fan_in))
        conv_ws.append(jax.random.uniform(keys[2 * i], (fan_in, nhid),
                                          jnp.float32, -scale, scale))
        conv_bs.append(jax.random.uniform(keys[2 * i + 1], (nhid,),
                                          jnp.float32, -scale, scale))
        fan_in = nhid
    scale = 1.0 / jnp.sqrt(float(nhid))
    lin3_w = jax.random.uniform(keys[-2], (nhid, nclass), jnp.float32, -scale, scale)
    lin3_b = jax.random.uniform(keys[-1], (nclass,), jnp.float32, -scale, scale)
    return conv_ws, conv_bs, lin3_w, lin3_b


if __name__ == "__main__":
    N_NODES, N_FEAT, N_HID, N_CLASS, N_CONVS = 64, 16, 32, 4, 3
    N_GRAPHS, N_EDGES = 8, 128

    key = jax.random.PRNGKey(0)
    k_x, k_adj, k_params = jax.random.split(key, 3)

    n_pad = _round_up(N_NODES, LANE)
    f_pad = _round_up(N_FEAT, LANE)
    g_pad = _round_up(N_GRAPHS, SUBLANE_BF16)

    # data.x, data.edge_index (as dense normalized adjacency), data.batch — built
    # directly at padded size, once.
    x = jax.random.normal(k_x, (N_NODES, N_FEAT), jnp.float32)
    x_p = pad_features(x, n_pad, f_pad)
    a_p = build_normalized_adjacency_padded(k_adj, N_NODES, N_EDGES, n_pad)
    batch = jnp.arange(N_NODES) // (N_NODES // N_GRAPHS)
    p_p = build_mean_pool_matrix_padded(batch, N_GRAPHS, g_pad, n_pad)

    conv_ws, conv_bs, lin3_w, lin3_b = init_params(
        k_params, N_FEAT, N_HID, N_CLASS, N_CONVS)
    conv_ws_p, conv_bs_p, lin_w_p, lin_b_p = prepare_gcn_params(
        conv_ws, conv_bs, lin3_w, lin3_b)

    out = gcn_forward(a_p, x_p, conv_ws_p, conv_bs_p, p_p, lin_w_p, lin_b_p,
                      n_class=N_CLASS, n_graphs=N_GRAPHS)
    out = jax.block_until_ready(out)

    assert out.shape == (N_GRAPHS, N_CLASS)
    # log_softmax rows should sum to ~1 in prob space
    assert jnp.allclose(jnp.sum(jnp.exp(out), axis=-1), 1.0, atol=1e-3)
    print("KERNEL_OK")
</pallas_src>

<mosaic_0001>
module attributes {stable_mosaic.version = 11 : i64} {
  func.func @kernel(%arg0: memref<128x128xbf16, #tpu.memory_space<vmem>>, %arg1: memref<128x128xbf16, #tpu.memory_space<vmem>>, %arg2: memref<128x128xbf16, #tpu.memory_space<vmem>>, %arg3: memref<1x128xf32, #tpu.memory_space<vmem>>, %arg4: memref<128x128xbf16, #tpu.memory_space<vmem>>, %arg5: memref<1x128xf32, #tpu.memory_space<vmem>>, %arg6: memref<128x128xbf16, #tpu.memory_space<vmem>>, %arg7: memref<1x128xf32, #tpu.memory_space<vmem>>, %arg8: memref<16x128xbf16, #tpu.memory_space<vmem>>, %arg9: memref<128x128xbf16, #tpu.memory_space<vmem>>, %arg10: memref<1x128xf32, #tpu.memory_space<vmem>>, %arg11: memref<16x128xf32, #tpu.memory_space<vmem>>) attributes {dimension_semantics = [], scalar_prefetch = 0 : i64, scratch_operands = 0 : i64, tpu.core_type = #tpu.core_type<tc>} {
    %c0 = arith.constant 0 : index
    %c0_0 = arith.constant 0 : index
    %0 = vector.load %arg0[%c0, %c0_0] : memref<128x128xbf16, #tpu.memory_space<vmem>>, vector<128x128xbf16>
    %c0_1 = arith.constant 0 : index
    %c0_2 = arith.constant 0 : index
    %1 = vector.load %arg1[%c0_1, %c0_2] : memref<128x128xbf16, #tpu.memory_space<vmem>>, vector<128x128xbf16>
    %c0_3 = arith.constant 0 : index
    %c0_4 = arith.constant 0 : index
    %2 = vector.load %arg2[%c0_3, %c0_4] : memref<128x128xbf16, #tpu.memory_space<vmem>>, vector<128x128xbf16>
    %c0_5 = arith.constant 0 : index
    %c0_6 = arith.constant 0 : index
    %3 = vector.load %arg3[%c0_5, %c0_6] : memref<1x128xf32, #tpu.memory_space<vmem>>, vector<1x128xf32>
    %cst = arith.constant dense<0.000000e+00> : vector<128x128xf32>
    %4 = tpu.matmul %1, %2, %cst {dimension_numbers = #tpu.dot_dimension_numbers<[1], [0], [0], [1], [0, 0, 1, 1], [], []>} : vector<128x128xbf16>, vector<128x128xbf16>, vector<128x128xf32> -> vector<128x128xf32>
    %5 = arith.truncf %4 : vector<128x128xf32> to vector<128x128xbf16>
    %cst_7 = arith.constant dense<0.000000e+00> : vector<128x128xf32>
    %6 = tpu.matmul %0, %5, %cst_7 {dimension_numbers = #tpu.dot_dimension_numbers<[1], [0], [0], [1], [0, 0, 1, 1], [], []>} : vector<128x128xbf16>, vector<128x128xbf16>, vector<128x128xf32> -> vector<128x128xf32>
    %7 = vector.broadcast %3 : vector<1x128xf32> to vector<128x128xf32>
    %8 = arith.addf %6, %7 : vector<128x128xf32>
    %cst_8 = arith.constant 0.000000e+00 : f32
    %9 = vector.broadcast %cst_8 : f32 to vector<128x128xf32>
    %10 = arith.maximumf %8, %9 : vector<128x128xf32>
    %11 = arith.truncf %10 : vector<128x128xf32> to vector<128x128xbf16>
    %c0_9 = arith.constant 0 : index
    %c0_10 = arith.constant 0 : index
    %12 = vector.load %arg4[%c0_9, %c0_10] : memref<128x128xbf16, #tpu.memory_space<vmem>>, vector<128x128xbf16>
    %c0_11 = arith.constant 0 : index
    %c0_12 = arith.constant 0 : index
    %13 = vector.load %arg5[%c0_11, %c0_12] : memref<1x128xf32, #tpu.memory_space<vmem>>, vector<1x128xf32>
    %cst_13 = arith.constant dense<0.000000e+00> : vector<128x128xf32>
    %14 = tpu.matmul %11, %12, %cst_13 {dimension_numbers = #tpu.dot_dimension_numbers<[1], [0], [0], [1], [0, 0, 1, 1], [], []>} : vector<128x128xbf16>, vector<128x128xbf16>, vector<128x128xf32> -> vector<128x128xf32>
    %15 = arith.truncf %14 : vector<128x128xf32> to vector<128x128xbf16>
    %cst_14 = arith.constant dense<0.000000e+00> : vector<128x128xf32>
    %16 = tpu.matmul %0, %15, %cst_14 {dimension_numbers = #tpu.dot_dimension_numbers<[1], [0], [0], [1], [0, 0, 1, 1], [], []>} : vector<128x128xbf16>, vector<128x128xbf16>, vector<128x128xf32> -> vector<128x128xf32>
    %17 = vector.broadcast %13 : vector<1x128xf32> to vector<128x128xf32>
    %18 = arith.addf %16, %17 : vector<128x128xf32>
    %cst_15 = arith.constant 0.000000e+00 : f32
    %19 = vector.broadcast %cst_15 : f32 to vector<128x128xf32>
    %20 = arith.maximumf %18, %19 : vector<128x128xf32>
    %21 = arith.truncf %20 : vector<128x128xf32> to vector<128x128xbf16>
    %c0_16 = arith.constant 0 : index
    %c0_17 = arith.constant 0 : index
    %22 = vector.load %arg6[%c0_16, %c0_17] : memref<128x128xbf16, #tpu.memory_space<vmem>>, vector<128x128xbf16>
    %c0_18 = arith.constant 0 : index
    %c0_19 = arith.constant 0 : index
    %23 = vector.load %arg7[%c0_18, %c0_19] : memref<1x128xf32, #tpu.memory_space<vmem>>, vector<1x128xf32>
    %cst_20 = arith.constant dense<0.000000e+00> : vector<128x128xf32>
    %24 = tpu.matmul %21, %22, %cst_20 {dimension_numbers = #tpu.dot_dimension_numbers<[1], [0], [0], [1], [0, 0, 1, 1], [], []>} : vector<128x128xbf16>, vector<128x128xbf16>, vector<128x128xf32> -> vector<128x128xf32>
    %25 = arith.truncf %24 : vector<128x128xf32> to vector<128x128xbf16>
    %cst_21 = arith.constant dense<0.000000e+00> : vector<128x128xf32>
    %26 = tpu.matmul %0, %25, %cst_21 {dimension_numbers = #tpu.dot_dimension_numbers<[1], [0], [0], [1], [0, 0, 1, 1], [], []>} : vector<128x128xbf16>, vector<128x128xbf16>, vector<128x128xf32> -> vector<128x128xf32>
    %27 = vector.broadcast %23 : vector<1x128xf32> to vector<128x128xf32>
    %28 = arith.addf %26, %27 : vector<128x128xf32>
    %cst_22 = arith.constant 0.000000e+00 : f32
    %29 = vector.broadcast %cst_22 : f32 to vector<128x128xf32>
    %30 = arith.maximumf %28, %29 : vector<128x128xf32>
    %31 = arith.truncf %30 : vector<128x128xf32> to vector<128x128xbf16>
    %c0_23 = arith.constant 0 : index
    %c0_24 = arith.constant 0 : index
    %32 = vector.load %arg8[%c0_23, %c0_24] : memref<16x128xbf16, #tpu.memory_space<vmem>>, vector<16x128xbf16>
    %c0_25 = arith.constant 0 : index
    %c0_26 = arith.constant 0 : index
    %33 = vector.load %arg9[%c0_25, %c0_26] : memref<128x128xbf16, #tpu.memory_space<vmem>>, vector<128x128xbf16>
    %c0_27 = arith.constant 0 : index
    %c0_28 = arith.constant 0 : index
    %34 = vector.load %arg10[%c0_27, %c0_28] : memref<1x128xf32, #tpu.memory_space<vmem>>, vector<1x128xf32>
    %cst_29 = arith.constant dense<0.000000e+00> : vector<16x128xf32>
    %35 = tpu.matmul %32, %31, %cst_29 {dimension_numbers = #tpu.dot_dimension_numbers<[1], [0], [0], [1], [0, 0, 1, 1], [], []>} : vector<16x128xbf16>, vector<128x128xbf16>, vector<16x128xf32> -> vector<16x128xf32>
    %36 = arith.truncf %35 : vector<16x128xf32> to vector<16x128xbf16>
    %cst_30 = arith.constant dense<0.000000e+00> : vector<16x128xf32>
    %37 = tpu.matmul %36, %33, %cst_30 {dimension_numbers = #tpu.dot_dimension_numbers<[1], [0], [0], [1], [0, 0, 1, 1], [], []>} : vector<16x128xbf16>, vector<128x128xbf16>, vector<16x128xf32> -> vector<16x128xf32>
    %38 = vector.broadcast %34 : vector<1x128xf32> to vector<16x128xf32>
    %39 = arith.addf %37, %38 : vector<16x128xf32>
    %40 = tpu.iota {dimensions = array<i32: 1>} : vector<16x128xi32>
    %c4_i32 = arith.constant 4 : i32
    %41 = vector.broadcast %c4_i32 : i32 to vector<16x128xi32>
    %42 = arith.cmpi slt, %40, %41 : vector<16x128xi32>
    %cst_31 = arith.constant -1.000000e+30 : f32
    %43 = vector.broadcast %cst_31 : f32 to vector<16x128xf32>
    %44 = arith.select %42, %39, %43 : vector<16x128xi1>, vector<16x128xf32>
    %cst_32 = arith.constant dense<0xFF800000> : vector<16xf32>
    %45 = vector.multi_reduction <maximumf>, %44, %cst_32 [1] : vector<16x128xf32> to vector<16xf32>
    %46 = vector.shape_cast %45 : vector<16xf32> to vector<16x1xf32>
    %47 = vector.broadcast %46 : vector<16x1xf32> to vector<16x128xf32>
    %48 = arith.subf %44, %47 : vector<16x128xf32>
    %49 = math.exp %48 : vector<16x128xf32>
    %cst_33 = arith.constant dense<0.000000e+00> : vector<16xf32>
    %50 = vector.multi_reduction <add>, %49, %cst_33 [1] : vector<16x128xf32> to vector<16xf32>
    %51 = vector.shape_cast %50 : vector<16xf32> to vector<16x1xf32>
    %52 = math.log %51 : vector<16x1xf32>
    %53 = vector.broadcast %52 : vector<16x1xf32> to vector<16x128xf32>
    %54 = arith.subf %48, %53 : vector<16x128xf32>
    %c0_34 = arith.constant 0 : index
    %c0_35 = arith.constant 0 : index
    %55 = vector.load %arg11[%c0_34, %c0_35] : memref<16x128xf32, #tpu.memory_space<vmem>>, vector<16x128xf32>
    tpu.vector_store %arg11[%c0_34, %c0_35], %54 {strides = array<i32>} : memref<16x128xf32, #tpu.memory_space<vmem>>, vector<16x128xf32>,
    return
  }
}

</mosaic_0001>

<bundles_post_ra>
// kernel: gcn_forward.1
= control target key start
LH: loop header
LB: loop body
LE: loop exit
PB: predicated region body
PF: predicated region fallthrough
CT: control target
= control target key end

     0   :  { %16 = vsyncpa [#allocation3], 0  ;;  %s2203_s0 = inlined_call_operand.hbm [shape: bf16[128,128], index: 0, kind: input, shape index: {}]   ;;  %s2204_s1 = inlined_call_operand.hbm [shape: bf16[128,128], index: 1, kind: input, shape index: {}]   ;;  %s2205_s2 = inlined_call_operand.hbm [shape: bf16[128,128], index: 2, kind: input, shape index: {}]   ;;  %s2206_s3 = inlined_call_operand.vmem [shape: f32[1,128], index: 3, kind: input, shape index: {}]   ;;  %s2207_s4 = inlined_call_operand.hbm [shape: bf16[128,128], index: 4, kind: input, shape index: {}]   ;;  %s2208_s5 = inlined_call_operand.vmem [shape: f32[1,128], index: 5, kind: input, shape index: {}]   ;;  %s2209_s6 = inlined_call_operand.hbm [shape: bf16[128,128], index: 6, kind: input, shape index: {}]   ;;  %s2210_s7 = inlined_call_operand.vmem [shape: f32[1,128], index: 7, kind: input, shape index: {}]   ;;  %s2211_s8 = inlined_call_operand.vmem [shape: bf16[16,128], index: 8, kind: input, shape index: {}]   ;;  %s2212_s9 = inlined_call_operand.hbm [shape: bf16[128,128], index: 9, kind: input, shape index: {}]   ;;  %s2213_s10 = inlined_call_operand.vmem [shape: f32[1,128], index: 10, kind: input, shape index: {}]   ;;  %s2214_s11 = inlined_call_operand.vmem [shape: f32[16,128], index: 11, kind: output, shape index: {}]  }
   0x1   :  { %17 = vsyncpa [#allocation5], 0 }
   0x2   :  { %18 = vsyncpa [#allocation8], 0 }
   0x3   :  { %19 = vsyncpa [#allocation11], 0  ;;  %s1943_s17 = smov [#allocation4]   ;;  %s1944_s19 = smov [#allocation7]  }
   0x4   :  { %s37_s18 = sshll.u32 %s1943_s17, 4  ;;  %s63_s20 = sshll.u32 %s1944_s19, 4  ;;  %s38_s18 = int_to_ptr.vmem [resolvable:$true] %s37_s18  ;;  %s2013_s20 = int_to_ptr.vmem [resolvable:$true] %s63_s20 }
   0x5   :  { %s1803_s23 = scalar_lea.hbm %s2204_s1, 1024 }
   0x6   :  { %p1804_p0 = scmp.ne.s32.totalorder %s2204_s1, %s1803_s23  ;;  %p1807_p1 = scmp.lt.u32.totalorder %s1803_s23, %s2204_s1 }
   0x8   :  { %p1809_p2 = pnand %p1807_p1, %p1804_p0 }
   0xa   :  { %1812 = shalt.err (!%p1809_p2)
}
   0xb   :  { %s1813_s28 = scalar_lea.vmem %s38_s18, 1024  ;;  %p1818_p4 = scmp.lt.s32.totalorder %s38_s18, %s38_s18 }
   0xc   :  { %p1814_p3 = scmp.ne.s32.totalorder %s38_s18, %s1813_s28  ;;  %p1819_p5 = scmp.lt.s32.totalorder %s1813_s28, %s1813_s28 }
   0xe   :  { %p1820_p6 = por %p1819_p5, %p1818_p4 }
  0x10   :  { %p1821_p7 = pnand %p1820_p6, %p1814_p3 }
  0x12   :  { %1824 = shalt.err (!%p1821_p7)
}
  0x13   :  { %s1945_s29 = smov 64   ;;  %s1946_s30 = smov 4  }
  0x14   :  { %43 = dma.hbm_to_vmem [thread:$0]  %s2204_s1, 1024, %s38_s18, [#allocation5], %s1945_s29, %s1945_s29, %s1946_s30  }
  0x15   :  { %s1825_s16 = scalar_lea.hbm %s2207_s4, 1024 }
  0x16   :  { %p1826_p8 = scmp.ne.s32.totalorder %s2207_s4, %s1825_s16  ;;  %p1829_p9 = scmp.lt.u32.totalorder %s1825_s16, %s2207_s4 }
  0x18   :  { %p1831_p10 = pnand %p1829_p9, %p1826_p8 }
  0x1a   :  { %1834 = shalt.err (!%p1831_p10)
}
  0x1b   :  { %s1835_s23 = scalar_lea.vmem %s2013_s20, 1024  ;;  %p1840_p12 = scmp.lt.s32.totalorder %s2013_s20, %s2013_s20 }
  0x1c   :  { %p1836_p11 = scmp.ne.s32.totalorder %s2013_s20, %s1835_s23  ;;  %p1841_p13 = scmp.lt.s32.totalorder %s1835_s23, %s1835_s23 }
  0x1e   :  { %p1842_p0 = por %p1841_p13, %p1840_p12 }
  0x20   :  { %p1843_p1 = pnand %p1842_p0, %p1836_p11 }
  0x22   :  { %1846 = shalt.err (!%p1843_p1)
}
  0x23   :  { %69 = dma.hbm_to_vmem [thread:$0]  %s2207_s4, 1024, %s2013_s20, [#allocation8], %s1945_s29, %s1945_s29, %s1946_s30  }
  0x24   :  { %s1947_s24 = smov [#allocation2]   ;;  %s1948_s26 = smov [#allocation6]  }
  0x25   :  { %s25_s25 = sshll.u32 %s1947_s24, 4  ;;  %s49_s27 = sshll.u32 %s1948_s26, 4  ;;  %s26_s25 = int_to_ptr.vmem [resolvable:$true] %s25_s25  ;;  %s2050_s27 = int_to_ptr.vmem [resolvable:$true] %s49_s27 }
  0x26   :  { %s1847_s13 = scalar_lea.hbm %s2203_s0, 1024 }
  0x27   :  { %p1848_p2 = scmp.ne.s32.totalorder %s2203_s0, %s1847_s13  ;;  %p1851_p3 = scmp.lt.u32.totalorder %s1847_s13, %s2203_s0 }
  0x29   :  { %p1853_p4 = pnand %p1851_p3, %p1848_p2 }
  0x2b   :  { %1856 = shalt.err (!%p1853_p4)
}
  0x2c   :  { %s1857_s4 = scalar_lea.vmem %s26_s25, 1024  ;;  %p1862_p6 = scmp.lt.s32.totalorder %s26_s25, %s26_s25 }
  0x2d   :  { %p1858_p5 = scmp.ne.s32.totalorder %s26_s25, %s1857_s4  ;;  %p1863_p7 = scmp.lt.s32.totalorder %s1857_s4, %s1857_s4 }
  0x2f   :  { %p1864_p8 = por %p1863_p7, %p1862_p6 }
  0x31   :  { %p1865_p9 = pnand %p1864_p8, %p1858_p5 }
  0x33   :  { %1868 = shalt.err (!%p1865_p9)
}
  0x34   :  { %31 = dma.hbm_to_vmem [thread:$0]  %s2203_s0, 1024, %s26_s25, [#allocation3], %s1945_s29, %s1945_s29, %s1946_s30  }
  0x35   :  { %s1869_s23 = scalar_lea.hbm %s2205_s2, 1024 }
  0x36   :  { %p1870_p10 = scmp.ne.s32.totalorder %s2205_s2, %s1869_s23  ;;  %p1873_p11 = scmp.lt.u32.totalorder %s1869_s23, %s2205_s2 }
  0x38   :  { %p1875_p12 = pnand %p1873_p11, %p1870_p10 }
  0x3a   :  { %1878 = shalt.err (!%p1875_p12)
}
  0x3b   :  { %s1879_s28 = scalar_lea.vmem %s2050_s27, 1024  ;;  %p1884_p0 = scmp.lt.s32.totalorder %s2050_s27, %s2050_s27 }
  0x3c   :  { %p1880_p13 = scmp.ne.s32.totalorder %s2050_s27, %s1879_s28  ;;  %p1885_p1 = scmp.lt.s32.totalorder %s1879_s28, %s1879_s28 }
  0x3e   :  { %p1886_p2 = por %p1885_p1, %p1884_p0 }
  0x40   :  { %p1887_p3 = pnand %p1886_p2, %p1880_p13 }
  0x42   :  { %1890 = shalt.err (!%p1887_p3)
}
  0x43   :  { %55 = dma.hbm_to_vmem [thread:$0]  %s2205_s2, 1024, %s2050_s27, [#allocation5], %s1945_s29, %s1945_s29, %s1946_s30  }
  0x44   :  { %s1949_s12 = smov [#allocation9]   ;;  %s1950_s14 = smov [#allocation10]  }
  0x45   :  { %s77_s13 = sshll.u32 %s1949_s12, 4  ;;  %s93_s15 = sshll.u32 %s1950_s14, 4  ;;  %s78_s13 = int_to_ptr.vmem [resolvable:$true] %s77_s13  ;;  %s2087_s15 = int_to_ptr.vmem [resolvable:$true] %s93_s15 }
  0x46   :  { %s1891_s4 = scalar_lea.hbm %s2209_s6, 1024 }
  0x47   :  { %p1892_p4 = scmp.ne.s32.totalorder %s2209_s6, %s1891_s4  ;;  %p1895_p5 = scmp.lt.u32.totalorder %s1891_s4, %s2209_s6 }
  0x49   :  { %p1897_p6 = pnand %p1895_p5, %p1892_p4 }
  0x4b   :  { %1900 = shalt.err (!%p1897_p6)
}
  0x4c   :  { %s1901_s2 = scalar_lea.vmem %s78_s13, 1024  ;;  %p1906_p8 = scmp.lt.s32.totalorder %s78_s13, %s78_s13 }
  0x4d   :  { %p1902_p7 = scmp.ne.s32.totalorder %s78_s13, %s1901_s2  ;;  %p1907_p9 = scmp.lt.s32.totalorder %s1901_s2, %s1901_s2 }
  0x4f   :  { %p1908_p10 = por %p1907_p9, %p1906_p8 }
  0x51   :  { %p1909_p11 = pnand %p1908_p10, %p1902_p7 }
  0x53   :  { %1912 = shalt.err (!%p1909_p11)
}
  0x54   :  { %83 = dma.hbm_to_vmem [thread:$0]  %s2209_s6, 1024, %s78_s13, [#allocation8], %s1945_s29, %s1945_s29, %s1946_s30  }
  0x55   :  { %s1913_s24 = scalar_lea.hbm %s2212_s9, 1024 }
  0x56   :  { %p1914_p12 = scmp.ne.s32.totalorder %s2212_s9, %s1913_s24  ;;  %p1917_p13 = scmp.lt.u32.totalorder %s1913_s24, %s2212_s9 }
  0x58   :  { %p1919_p0 = pnand %p1917_p13, %p1914_p12 }
  0x5a   :  { %1922 = shalt.err (!%p1919_p0)
}
  0x5b   :  { %s1923_s12 = scalar_lea.vmem %s2087_s15, 1024  ;;  %p1928_p2 = scmp.lt.s32.totalorder %s2087_s15, %s2087_s15 }
  0x5c   :  { %p1924_p1 = scmp.ne.s32.totalorder %s2087_s15, %s1923_s12  ;;  %p1929_p3 = scmp.lt.s32.totalorder %s1923_s12, %s1923_s12 }
  0x5e   :  { %p1930_p4 = por %p1929_p3, %p1928_p2 }
  0x60   :  { %p1931_p5 = pnand %p1930_p4, %p1924_p1 }
  0x62   :  { %1934 = shalt.err (!%p1931_p5)
}
  0x63   :  { %99 = dma.hbm_to_vmem [thread:$0]  %s2212_s9, 1024, %s2087_s15, [#allocation11], %s1945_s29, %s1945_s29, %s1946_s30  }
  0x64   :  { %1935 = dma.done.wait [#allocation3], 1024  }
  0x65   :  { %1936 = vsyncadd [#allocation3], 4294966272 }
  0x66   :  { %1937 = dma.done.wait [#allocation5], 2048  }
  0x67   :  { %1938 = vsyncadd [#allocation5], 4294965248 }
  0x68   :  { %1939 = dma.done.wait [#allocation8], 2048  }
  0x69   :  { %1940 = vsyncadd [#allocation8], 4294965248 }
  0x6a   :  { %1941 = dma.done.wait [#allocation11], 1024  }
  0x6b   :  { %1942 = vsyncadd [#allocation11], 4294966272  ;;  %v1746_v0 = vld [vmem:[#allocation6] sm:$0xff]   ;;  %v1747_v1 = vld [vmem:[#allocation6 + $0x8] sm:$0xff]   ;;  %vm1952_vm0 = vmmov 0  }
  0x6c   :  { %1504 = vmatprep.subr.bf16.mxu0 %v1746_v0  ;;  %v1748_v2 = vld [vmem:[#allocation6 + $0x10] sm:$0xff]   ;;  %v1749_v3 = vld [vmem:[#allocation6 + $0x18] sm:$0xff]   ;;  %v1754_v4 = vld [vmem:[#allocation4] sm:$0xff]  }
  0x6d   :  { %1505 = vmatpush3.bf16.msra.mxu0 %v1746_v0  ;;  %1520 = vmatprep.mubr.bf16.mxu0 %v1754_v4  ;;  %v1750_v5 = vld [vmem:[#allocation6 + $0x20] sm:$0xff]   ;;  %v1751_v6 = vld [vmem:[#allocation6 + $0x28] sm:$0xff]   ;;  %v1752_v7 = vld [vmem:[#allocation6 + $0x30] sm:$0xff]  }
  0x6e   :  { %1506 = vmatprep.subr.bf16.mxu0 %v1747_v1  ;;  %v1753_v8 = vld [vmem:[#allocation6 + $0x38] sm:$0xff]   ;;  %v1755_v9 = vld [vmem:[#allocation4 + $0x8] sm:$0xff]   ;;  %v1756_v10 = vld [vmem:[#allocation4 + $0x10] sm:$0xff]  }
  0x6f   :  { %v1757_v11 = vld [vmem:[#allocation4 + $0x18] sm:$0xff]   ;;  %v1758_v12 = vld [vmem:[#allocation4 + $0x20] sm:$0xff]   ;;  %v1759_v13 = vld [vmem:[#allocation4 + $0x28] sm:$0xff]  }
  0x70   :  { %v1760_v14 = vld [vmem:[#allocation4 + $0x30] sm:$0xff]   ;;  %v1761_v15 = vld [vmem:[#allocation4 + $0x38] sm:$0xff]   ;;  %v2124_v16 = vld [vmem:[#allocation2] sm:$0xff]  }
  0x71   :  { %1507 = vmatpush3.bf16.msra.mxu0 %v1747_v1  ;;  %1552 = vmatprep.mubr.bf16.mxu1 %v2124_v16  ;;  %v1770_v17 = vld [vmem:[#allocation7] sm:$0xff]   ;;  %v1771_v18 = vld [vmem:[#allocation7 + $0x8] sm:$0xff]   ;;  %v1772_v19 = vld [vmem:[#allocation7 + $0x10] sm:$0xff]  }
  0x72   :  { %1508 = vmatprep.subr.bf16.mxu0 %v1748_v2  ;;  %v1773_v20 = vld [vmem:[#allocation7 + $0x18] sm:$0xff]   ;;  %v1774_v21 = vld [vmem:[#allocation7 + $0x20] sm:$0xff]   ;;  %v1775_v22 = vld [vmem:[#allocation7 + $0x28] sm:$0xff]  }
  0x73   :  { %v2127_v47 = vld [vmem:[#allocation2 + $0x8] sm:$0xff]   ;;  %v2129_v48 = vld [vmem:[#allocation2 + $0x10] sm:$0xff]   ;;  %v2133_v49 = vld [vmem:[#allocation2 + $0x18] sm:$0xff]  }
  0x74   :  { %v2135_v50 = vld [vmem:[#allocation2 + $0x20] sm:$0xff]   ;;  %v2139_v51 = vld [vmem:[#allocation2 + $0x28] sm:$0xff]   ;;  %v2141_v52 = vld [vmem:[#allocation2 + $0x30] sm:$0xff]  }
  0x75   :  { %1509 = vmatpush3.bf16.msra.mxu0 %v1748_v2  ;;  %v2145_v53 = vld [vmem:[#allocation2 + $0x38] sm:$0xff]   ;;  %v1776_v54 = vld [vmem:[#allocation7 + $0x30] sm:$0xff]   ;;  %v1353_v56 = vld [vmem:[%s2206_s3] ss:$0 sm:$0xff] }
  0x76   :  { %1510 = vmatprep.subr.bf16.mxu0 %v1749_v3  ;;  %v1777_v55 = vld [vmem:[#allocation7 + $0x38] sm:$0xff]  }
  0x79   :  { %1511 = vmatpush3.bf16.msra.mxu0 %v1749_v3 }
  0x7a   :  { %1512 = vmatprep.subr.bf16.mxu0 %v1750_v5 }
  0x7d   :  { %1513 = vmatpush3.bf16.msra.mxu0 %v1750_v5 }
  0x7e   :  { %1514 = vmatprep.subr.bf16.mxu0 %v1751_v6 }
  0x81   :  { %1515 = vmatpush3.bf16.msra.mxu0 %v1751_v6 }
  0x82   :  { %1516 = vmatprep.subr.bf16.mxu0 %v1752_v7 }
  0x85   :  { %1517 = vmatpush3.bf16.msra.mxu0 %v1752_v7 }
  0x86   :  { %1518 = vmatprep.subr.bf16.mxu0 %v1753_v8 }
  0x89   :  { %1519 = vmatpush3.bf16.msra.mxu0 %v1753_v8 }
  0x8a   :  { %1568 = vmatprep.subr.bf16.mxu0 %v1770_v17 }
  0x8c   :  { %1521 = vmatmul.mubr.bf16.vlgmr.msra.gmra.mrb[0].mxu0 %v1755_v9 }
  0x8d   :  { %1524 = vmatprep.mubr.bf16.mxu0 %v1756_v10  ;;  %1569 = vmatpush3.bf16.msra.mxu0 %v1770_v17 }
  0x8e   :  { %1570 = vmatprep.subr.bf16.mxu0 %v1771_v18 }
  0x91   :  { %1571 = vmatpush3.bf16.msra.mxu0 %v1771_v18 }
  0x92   :  { %1572 = vmatprep.subr.bf16.mxu0 %v1772_v19 }
  0x94   :  { %1525 = vmatmul.mubr.bf16.gmra.mrb[4].mxu0 %v1757_v11 }
  0x95   :  { %1528 = vmatprep.mubr.bf16.mxu0 %v1758_v12  ;;  %1573 = vmatpush3.bf16.msra.mxu0 %v1772_v19 }
  0x96   :  { %1574 = vmatprep.subr.bf16.mxu0 %v1773_v20 }
  0x99   :  { %1575 = vmatpush3.bf16.msra.mxu0 %v1773_v20 }
  0x9a   :  { %1576 = vmatprep.subr.bf16.mxu0 %v1774_v21 }
  0x9c   :  { %1529 = vmatmul.mubr.bf16.gmra.mrb[8].mxu0 %v1759_v13 }
  0x9d   :  { %1532 = vmatprep.mubr.bf16.mxu0 %v1760_v14  ;;  %1577 = vmatpush3.bf16.msra.mxu0 %v1774_v21 }
  0x9e   :  { %1578 = vmatprep.subr.bf16.mxu0 %v1775_v22 }
  0xa1   :  { %1579 = vmatpush3.bf16.msra.mxu0 %v1775_v22 }
  0xa2   :  { %1580 = vmatprep.subr.bf16.mxu0 %v1776_v54 }
  0xa4   :  { %1533 = vmatmul.mubr.bf16.gmra.mrb[12].mxu0 %v1761_v15 }
  0xa5   :  { %1581 = vmatpush3.bf16.msra.mxu0 %v1776_v54 }
  0xa6   :  { %1582 = vmatprep.subr.bf16.mxu0 %v1777_v55 }
  0xa9   :  { %1583 = vmatpush3.bf16.msra.mxu0 %v1777_v55 }
 0x15f   :  { %v1522_v23 = vpop.f32.mrb[0].mxu0 }
 0x160   :  { %v300_v24 = vpop.f32.mrb[1].mxu0 }
 0x161   :  { %v1523_v25 = vpop.f32.mrb[2].mxu0 }
 0x162   :  { %v364_v26 = vpack.c.bf16 %v1523_v25, %v1522_v23  ;;  %v303_v27 = vpop.f32.mrb[3].mxu0 }
 0x163   :  { %v363_v28 = vpack.c.bf16 %v303_v27, %v300_v24 }
 0x165   :  { %1536 = vmatprep.subr.bf16.mxu1 %v363_v28 }
 0x166   :  { %1537 = vmatpush3.bf16.msra.mxu1 %v363_v28 }
 0x167   :  { %v1526_v29 = vpop.f32.mrb[4].mxu0  ;;  %1538 = vmatprep.subr.bf16.mxu1 %v364_v26 }
 0x168   :  { %v316_v30 = vpop.f32.mrb[5].mxu0 }
 0x169   :  { %v1527_v31 = vpop.f32.mrb[6].mxu0 }
 0x16a   :  { %v366_v32 = vpack.c.bf16 %v1527_v31, %v1526_v29  ;;  %v319_v33 = vpop.f32.mrb[7].mxu0  ;;  %1539 = vmatpush3.bf16.msra.mxu1 %v364_v26 }
 0x16b   :  { %v365_v34 = vpack.c.bf16 %v319_v33, %v316_v30 }
 0x16d   :  { %1540 = vmatprep.subr.bf16.mxu1 %v365_v34 }
 0x16e   :  { %1541 = vmatpush3.bf16.msra.mxu1 %v365_v34 }
 0x16f   :  { %v1530_v35 = vpop.f32.mrb[8].mxu0  ;;  %1542 = vmatprep.subr.bf16.mxu1 %v366_v32 }
 0x170   :  { %v332_v36 = vpop.f32.mrb[9].mxu0 }
 0x171   :  { %v1531_v37 = vpop.f32.mrb[10].mxu0 }
 0x172   :  { %v368_v38 = vpack.c.bf16 %v1531_v37, %v1530_v35  ;;  %v335_v39 = vpop.f32.mrb[11].mxu0  ;;  %1543 = vmatpush3.bf16.msra.mxu1 %v366_v32 }
 0x173   :  { %v367_v40 = vpack.c.bf16 %v335_v39, %v332_v36 }
 0x175   :  { %1544 = vmatprep.subr.bf16.mxu1 %v367_v40 }
 0x176   :  { %1545 = vmatpush3.bf16.msra.mxu1 %v367_v40 }
 0x177   :  { %v1534_v41 = vpop.f32.mrb[12].mxu0  ;;  %1546 = vmatprep.subr.bf16.mxu1 %v368_v38 }
 0x178   :  { %v348_v42 = vpop.f32.mrb[13].mxu0 }
 0x179   :  { %v1535_v43 = vpop.f32.mrb[14].mxu0 }
 0x17a   :  { %v370_v44 = vpack.c.bf16 %v1535_v43, %v1534_v41  ;;  %v351_v45 = vpop.f32.mrb[15].mxu0  ;;  %1547 = vmatpush3.bf16.msra.mxu1 %v368_v38 }
 0x17b   :  { %v369_v46 = vpack.c.bf16 %v351_v45, %v348_v42 }
 0x17d   :  { %1548 = vmatprep.subr.bf16.mxu1 %v369_v46 }
 0x17e   :  { %1549 = vmatpush3.bf16.msra.mxu1 %v369_v46 }
 0x17f   :  { %1550 = vmatprep.subr.bf16.mxu1 %v370_v44 }
 0x182   :  { %1551 = vmatpush3.bf16.msra.mxu1 %v370_v44 }
 0x185   :  { %1553 = vmatmul.mubr.bf16.vlgmr.msra.gmra.mrb[0].mxu1 %v2127_v47 }
 0x186   :  { %1556 = vmatprep.mubr.bf16.mxu1 %v2129_v48 }
 0x18d   :  { %1557 = vmatmul.mubr.bf16.gmra.mrb[4].mxu1 %v2133_v49 }
 0x18e   :  { %1560 = vmatprep.mubr.bf16.mxu1 %v2135_v50 }
 0x195   :  { %1561 = vmatmul.mubr.bf16.gmra.mrb[8].mxu1 %v2139_v51 }
 0x196   :  { %1564 = vmatprep.mubr.bf16.mxu1 %v2141_v52 }
 0x19d   :  { %1565 = vmatmul.mubr.bf16.gmra.mrb[12].mxu1 %v2145_v53 }
 0x19e   :  { %1616 = vmatprep.mubr.bf16.mxu1 %v2124_v16 }
 0x258   :  { %v1554_v57 = vpop.f32.mrb[0].mxu1 }
 0x259   :  { %v468_v58 = vadd.f32 %v1554_v57, %v1353_v56  ;;  %v459_v59 = vpop.f32.mrb[1].mxu1 }
 0x25a   :  { %v460_v60 = vadd.f32 %v1353_v56, %v459_v59  ;;  %v1555_v61 = vpop.f32.mrb[2].mxu1  ;;  %v1779_v59 = vld [vmem:[#allocation9 + $0x8] sm:$0xff]  }
 0x25b   :  { %v471_v62 = vadd.f32 %v1555_v61, %v1353_v56  ;;  %v462_v63 = vpop.f32.mrb[3].mxu1  ;;  %v524_v1 = vmax.f32 %v468_v58, 0.0  ;;  %v1778_v58 = vld [vmem:[#allocation9] sm:$0xff]   ;;  %v1781_v61 = vld [vmem:[#allocation9 + $0x18] sm:$0xff]  }
 0x25c   :  { %v463_v0 = vadd.f32 %v1353_v56, %v462_v63  ;;  %v522_v3 = vmax.f32 %v460_v60, 0.0  ;;  %1632 = vmatprep.subr.bf16.mxu0 %v1778_v58  ;;  %v1780_v60 = vld [vmem:[#allocation9 + $0x10] sm:$0xff]  }
 0x25d   :  { %v525_v2 = vmax.f32 %v471_v62, 0.0  ;;  %v1783_v62 = vld [vmem:[#allocation9 + $0x28] sm:$0xff]  }
 0x25e   :  { %v523_v4 = vmax.f32 %v463_v0, 0.0 }
 0x25f   :  { %v539_v5 = vpack.c.bf16 %v525_v2, %v524_v1 }
 0x260   :  { %v538_v6 = vpack.c.bf16 %v523_v4, %v522_v3  ;;  %v1558_v7 = vpop.f32.mrb[4].mxu1 }
 0x261   :  { %v484_v8 = vadd.f32 %v1558_v7, %v1353_v56  ;;  %v475_v9 = vpop.f32.mrb[5].mxu1 }
 0x262   :  { %v476_v10 = vadd.f32 %v1353_v56, %v475_v9  ;;  %v1559_v11 = vpop.f32.mrb[6].mxu1  ;;  %1584 = vmatprep.mubr.bf16.mxu0 %v538_v6 }
 0x263   :  { %v487_v12 = vadd.f32 %v1559_v11, %v1353_v56  ;;  %v478_v13 = vpop.f32.mrb[7].mxu1  ;;  %1585 = vmatmul.mubr.bf16.vlgmr.msra.gmra.mrb[16].mxu0 %v539_v5  ;;  %v528_v15 = vmax.f32 %v484_v8, 0.0 }
 0x264   :  { %v479_v14 = vadd.f32 %v1353_v56, %v478_v13  ;;  %v526_v18 = vmax.f32 %v476_v10, 0.0  ;;  %1633 = vmatpush3.bf16.msra.mxu0 %v1778_v58 }
 0x265   :  { %v529_v17 = vmax.f32 %v487_v12, 0.0  ;;  %1634 = vmatprep.subr.bf16.mxu0 %v1779_v59 }
 0x266   :  { %v527_v19 = vmax.f32 %v479_v14, 0.0 }
 0x267   :  { %v541_v20 = vpack.c.bf16 %v529_v17, %v528_v15 }
 0x268   :  { %v540_v21 = vpack.c.bf16 %v527_v19, %v526_v18  ;;  %v1562_v22 = vpop.f32.mrb[8].mxu1  ;;  %1635 = vmatpush3.bf16.msra.mxu0 %v1779_v59 }
 0x269   :  { %v500_v23 = vadd.f32 %v1562_v22, %v1353_v56  ;;  %v491_v24 = vpop.f32.mrb[9].mxu1  ;;  %1636 = vmatprep.subr.bf16.mxu0 %v1780_v60 }
 0x26a   :  { %v492_v25 = vadd.f32 %v1353_v56, %v491_v24  ;;  %v1563_v26 = vpop.f32.mrb[10].mxu1  ;;  %1588 = vmatprep.mubr.bf16.mxu0 %v540_v21  ;;  %v1784_v24 = vld [vmem:[#allocation9 + $0x30] sm:$0xff]  }
 0x26b   :  { %v503_v27 = vadd.f32 %v1563_v26, %v1353_v56  ;;  %v494_v28 = vpop.f32.mrb[11].mxu1  ;;  %1589 = vmatmul.mubr.bf16.gmra.mrb[20].mxu0 %v541_v20  ;;  %v532_v30 = vmax.f32 %v500_v23, 0.0  ;;  %v1370_v26 = vld [vmem:[%s2208_s5] ss:$0 sm:$0xff] }
 0x26c   :  { %v495_v29 = vadd.f32 %v1353_v56, %v494_v28  ;;  %v530_v32 = vmax.f32 %v492_v25, 0.0  ;;  %1637 = vmatpush3.bf16.msra.mxu0 %v1780_v60  ;;  %v1785_v25 = vld [vmem:[#allocation9 + $0x38] sm:$0xff]  }
 0x26d   :  { %v533_v31 = vmax.f32 %v503_v27, 0.0  ;;  %1638 = vmatprep.subr.bf16.mxu0 %v1781_v61 }
 0x26e   :  { %v531_v33 = vmax.f32 %v495_v29, 0.0 }
 0x26f   :  { %v543_v34 = vpack.c.bf16 %v533_v31, %v532_v30 }
 0x270   :  { %v542_v35 = vpack.c.bf16 %v531_v33, %v530_v32  ;;  %v1566_v36 = vpop.f32.mrb[12].mxu1  ;;  %1639 = vmatpush3.bf16.msra.mxu0 %v1781_v61 }
 0x271   :  { %v516_v37 = vadd.f32 %v1566_v36, %v1353_v56  ;;  %v507_v38 = vpop.f32.mrb[13].mxu1 }
 0x272   :  { %v508_v39 = vadd.f32 %v1353_v56, %v507_v38  ;;  %v1567_v40 = vpop.f32.mrb[14].mxu1  ;;  %1592 = vmatprep.mubr.bf16.mxu0 %v542_v35 }
 0x273   :  { %v519_v41 = vadd.f32 %v1567_v40, %v1353_v56  ;;  %v510_v42 = vpop.f32.mrb[15].mxu1  ;;  %1593 = vmatmul.mubr.bf16.gmra.mrb[24].mxu0 %v543_v34  ;;  %v536_v44 = vmax.f32 %v516_v37, 0.0 }
 0x274   :  { %v511_v43 = vadd.f32 %v1353_v56, %v510_v42  ;;  %v534_v46 = vmax.f32 %v508_v39, 0.0  ;;  %v1782_v56 = vld [vmem:[#allocation9 + $0x20] sm:$0xff]  }
 0x275   :  { %v537_v45 = vmax.f32 %v519_v41, 0.0  ;;  %1640 = vmatprep.subr.bf16.mxu0 %v1782_v56 }
 0x276   :  { %v535_v54 = vmax.f32 %v511_v43, 0.0  ;;  %1641 = vmatpush3.bf16.msra.mxu0 %v1782_v56 }
 0x277   :  { %v545_v55 = vpack.c.bf16 %v537_v45, %v536_v44  ;;  %1642 = vmatprep.subr.bf16.mxu0 %v1783_v62 }
 0x278   :  { %v544_v57 = vpack.c.bf16 %v535_v54, %v534_v46 }
 0x27a   :  { %1596 = vmatprep.mubr.bf16.mxu0 %v544_v57  ;;  %1643 = vmatpush3.bf16.msra.mxu0 %v1783_v62 }
 0x27b   :  { %1597 = vmatmul.mubr.bf16.gmra.mrb[28].mxu0 %v545_v55  ;;  %1644 = vmatprep.subr.bf16.mxu0 %v1784_v24 }
 0x27e   :  { %1645 = vmatpush3.bf16.msra.mxu0 %v1784_v24 }
 0x27f   :  { %1646 = vmatprep.subr.bf16.mxu0 %v1785_v25 }
 0x282   :  { %1647 = vmatpush3.bf16.msra.mxu0 %v1785_v25 }
 0x336   :  { %v1586_v63 = vpop.f32.mrb[16].mxu0 }
 0x337   :  { %v645_v0 = vpop.f32.mrb[17].mxu0 }
 0x338   :  { %v1587_v1 = vpop.f32.mrb[18].mxu0 }
 0x339   :  { %v709_v2 = vpack.c.bf16 %v1587_v1, %v1586_v63  ;;  %v648_v3 = vpop.f32.mrb[19].mxu0 }
 0x33a   :  { %v708_v4 = vpack.c.bf16 %v648_v3, %v645_v0 }
 0x33c   :  { %1600 = vmatprep.subr.bf16.mxu1 %v708_v4 }
 0x33d   :  { %1601 = vmatpush3.bf16.msra.mxu1 %v708_v4 }
 0x33e   :  { %v1590_v5 = vpop.f32.mrb[20].mxu0  ;;  %1602 = vmatprep.subr.bf16.mxu1 %v709_v2 }
 0x33f   :  { %v661_v6 = vpop.f32.mrb[21].mxu0 }
 0x340   :  { %v1591_v7 = vpop.f32.mrb[22].mxu0 }
 0x341   :  { %v711_v8 = vpack.c.bf16 %v1591_v7, %v1590_v5  ;;  %v664_v9 = vpop.f32.mrb[23].mxu0  ;;  %1603 = vmatpush3.bf16.msra.mxu1 %v709_v2 }
 0x342   :  { %v710_v10 = vpack.c.bf16 %v664_v9, %v661_v6 }
 0x344   :  { %1604 = vmatprep.subr.bf16.mxu1 %v710_v10 }
 0x345   :  { %1605 = vmatpush3.bf16.msra.mxu1 %v710_v10 }
 0x346   :  { %v1594_v11 = vpop.f32.mrb[24].mxu0  ;;  %1606 = vmatprep.subr.bf16.mxu1 %v711_v8 }
 0x347   :  { %v677_v12 = vpop.f32.mrb[25].mxu0 }
 0x348   :  { %v1595_v13 = vpop.f32.mrb[26].mxu0 }
 0x349   :  { %v713_v14 = vpack.c.bf16 %v1595_v13, %v1594_v11  ;;  %v680_v15 = vpop.f32.mrb[27].mxu0  ;;  %1607 = vmatpush3.bf16.msra.mxu1 %v711_v8 }
 0x34a   :  { %v712_v17 = vpack.c.bf16 %v680_v15, %v677_v12 }
 0x34c   :  { %1608 = vmatprep.subr.bf16.mxu1 %v712_v17 }
 0x34d   :  { %1609 = vmatpush3.bf16.msra.mxu1 %v712_v17 }
 0x34e   :  { %v1598_v18 = vpop.f32.mrb[28].mxu0  ;;  %1610 = vmatprep.subr.bf16.mxu1 %v713_v14 }
 0x34f   :  { %v693_v19 = vpop.f32.mrb[29].mxu0 }
 0x350   :  { %v1599_v20 = vpop.f32.mrb[30].mxu0 }
 0x351   :  { %v715_v21 = vpack.c.bf16 %v1599_v20, %v1598_v18  ;;  %v696_v22 = vpop.f32.mrb[31].mxu0  ;;  %1611 = vmatpush3.bf16.msra.mxu1 %v713_v14 }
 0x352   :  { %v714_v23 = vpack.c.bf16 %v696_v22, %v693_v19 }
 0x354   :  { %1612 = vmatprep.subr.bf16.mxu1 %v714_v23 }
 0x355   :  { %1613 = vmatpush3.bf16.msra.mxu1 %v714_v23 }
 0x356   :  { %1614 = vmatprep.subr.bf16.mxu1 %v715_v21 }
 0x359   :  { %1615 = vmatpush3.bf16.msra.mxu1 %v715_v21 }
 0x35c   :  { %1617 = vmatmul.mubr.bf16.vlgmr.msra.gmra.mrb[16].mxu1 %v2127_v47 }
 0x35d   :  { %1620 = vmatprep.mubr.bf16.mxu1 %v2129_v48 }
 0x364   :  { %1621 = vmatmul.mubr.bf16.gmra.mrb[20].mxu1 %v2133_v49 }
 0x365   :  { %1624 = vmatprep.mubr.bf16.mxu1 %v2135_v50 }
 0x36c   :  { %1625 = vmatmul.mubr.bf16.gmra.mrb[24].mxu1 %v2139_v51 }
 0x36d   :  { %1628 = vmatprep.mubr.bf16.mxu1 %v2141_v52 }
 0x374   :  { %1629 = vmatmul.mubr.bf16.gmra.mrb[28].mxu1 %v2145_v53 }
 0x375   :  { %1680 = vmatprep.mubr.bf16.mxu1 %v2124_v16 }
 0x42f   :  { %v1618_v27 = vpop.f32.mrb[16].mxu1 }
 0x430   :  { %v765_v28 = vadd.f32 %v1618_v27, %v1370_v26  ;;  %v756_v29 = vpop.f32.mrb[17].mxu1 }
 0x431   :  { %v757_v30 = vadd.f32 %v1370_v26, %v756_v29  ;;  %v1619_v31 = vpop.f32.mrb[18].mxu1 }
 0x432   :  { %v768_v32 = vadd.f32 %v1619_v31, %v1370_v26  ;;  %v759_v33 = vpop.f32.mrb[19].mxu1  ;;  %v821_v35 = vmax.f32 %v765_v28, 0.0 }
 0x433   :  { %v760_v34 = vadd.f32 %v1370_v26, %v759_v33  ;;  %v819_v36 = vmax.f32 %v757_v30, 0.0 }
 0x434   :  { %v822_v16 = vmax.f32 %v768_v32, 0.0 }
 0x435   :  { %v820_v37 = vmax.f32 %v760_v34, 0.0 }
 0x436   :  { %v836_v38 = vpack.c.bf16 %v822_v16, %v821_v35 }
 0x437   :  { %v835_v39 = vpack.c.bf16 %v820_v37, %v819_v36  ;;  %v1622_v40 = vpop.f32.mrb[20].mxu1 }
 0x438   :  { %v781_v41 = vadd.f32 %v1622_v40, %v1370_v26  ;;  %v772_v42 = vpop.f32.mrb[21].mxu1 }
 0x439   :  { %v773_v43 = vadd.f32 %v1370_v26, %v772_v42  ;;  %v1623_v44 = vpop.f32.mrb[22].mxu1  ;;  %1648 = vmatprep.mubr.bf16.mxu0 %v835_v39 }
 0x43a   :  { %v784_v45 = vadd.f32 %v1623_v44, %v1370_v26  ;;  %v775_v46 = vpop.f32.mrb[23].mxu1  ;;  %1649 = vmatmul.mubr.bf16.vlgmr.msra.gmra.mrb[32].mxu0 %v836_v38  ;;  %v825_v55 = vmax.f32 %v781_v41, 0.0 }
 0x43b   :  { %v776_v54 = vadd.f32 %v1370_v26, %v775_v46  ;;  %v823_v58 = vmax.f32 %v773_v43, 0.0 }
 0x43c   :  { %v826_v57 = vmax.f32 %v784_v45, 0.0 }
 0x43d   :  { %v824_v59 = vmax.f32 %v776_v54, 0.0 }
 0x43e   :  { %v838_v60 = vpack.c.bf16 %v826_v57, %v825_v55  ;;  %v1951_v57 = vmov 0.0  }
 0x43f   :  { %v837_v61 = vpack.c.bf16 %v824_v59, %v823_v58  ;;  %v1626_v56 = vpop.f32.mrb[24].mxu1  ;;  %1696 = vmatprep.subr.bf16.mxu0 %v1951_v57  ;;  %v1379_v58 = vld [vmem:[%s2210_s7] ss:$0 sm:$0xff] }
 0x440   :  { %v797_v62 = vadd.f32 %v1626_v56, %v1370_v26  ;;  %v788_v63 = vpop.f32.mrb[25].mxu1 }
 0x441   :  { %v789_v0 = vadd.f32 %v1370_v26, %v788_v63  ;;  %v1627_v1 = vpop.f32.mrb[26].mxu1  ;;  %1652 = vmatprep.mubr.bf16.mxu0 %v837_v61 }
 0x442   :  { %v800_v2 = vadd.f32 %v1627_v1, %v1370_v26  ;;  %v791_v3 = vpop.f32.mrb[27].mxu1  ;;  %1653 = vmatmul.mubr.bf16.gmra.mrb[36].mxu0 %v838_v60  ;;  %v829_v5 = vmax.f32 %v797_v62, 0.0 }
 0x443   :  { %v792_v4 = vadd.f32 %v1370_v26, %v791_v3  ;;  %v827_v7 = vmax.f32 %v789_v0, 0.0 }
 0x444   :  { %v830_v6 = vmax.f32 %v800_v2, 0.0 }
 0x445   :  { %v828_v8 = vmax.f32 %v792_v4, 0.0 }
 0x446   :  { %v840_v9 = vpack.c.bf16 %v830_v6, %v829_v5 }
 0x447   :  { %v839_v10 = vpack.c.bf16 %v828_v8, %v827_v7  ;;  %v1630_v11 = vpop.f32.mrb[28].mxu1 }
 0x448   :  { %v813_v12 = vadd.f32 %v1630_v11, %v1370_v26  ;;  %v804_v13 = vpop.f32.mrb[29].mxu1 }
 0x449   :  { %v805_v14 = vadd.f32 %v1370_v26, %v804_v13  ;;  %v1631_v15 = vpop.f32.mrb[30].mxu1  ;;  %1656 = vmatprep.mubr.bf16.mxu0 %v839_v10 }
 0x44a   :  { %v816_v17 = vadd.f32 %v1631_v15, %v1370_v26  ;;  %v807_v18 = vpop.f32.mrb[31].mxu1  ;;  %1657 = vmatmul.mubr.bf16.gmra.mrb[40].mxu0 %v840_v9  ;;  %v833_v20 = vmax.f32 %v813_v12, 0.0 }
 0x44b   :  { %v808_v19 = vadd.f32 %v1370_v26, %v807_v18  ;;  %v831_v22 = vmax.f32 %v805_v14, 0.0 }
 0x44c   :  { %v834_v21 = vmax.f32 %v816_v17, 0.0 }
 0x44d   :  { %v832_v23 = vmax.f32 %v808_v19, 0.0 }
 0x44e   :  { %v842_v24 = vpack.c.bf16 %v834_v21, %v833_v20 }
 0x44f   :  { %v841_v25 = vpack.c.bf16 %v832_v23, %v831_v22 }
 0x451   :  { %1660 = vmatprep.mubr.bf16.mxu0 %v841_v25 }
 0x452   :  { %1661 = vmatmul.mubr.bf16.gmra.mrb[44].mxu0 %v842_v24 }
 0x453   :  { %1712 = vmatprep.mubr.msk.bf16.mxu0 %vm1952_vm0, %v1951_v57 }
 0x50d   :  { %v1650_v27 = vpop.f32.mrb[32].mxu0 }
 0x50e   :  { %v942_v28 = vpop.f32.mrb[33].mxu0 }
 0x50f   :  { %v1651_v29 = vpop.f32.mrb[34].mxu0 }
 0x510   :  { %v1006_v30 = vpack.c.bf16 %v1651_v29, %v1650_v27  ;;  %v945_v31 = vpop.f32.mrb[35].mxu0 }
 0x511   :  { %v1005_v32 = vpack.c.bf16 %v945_v31, %v942_v28 }
 0x513   :  { %1664 = vmatprep.subr.bf16.mxu1 %v1005_v32 }
 0x514   :  { %1665 = vmatpush3.bf16.msra.mxu1 %v1005_v32 }
 0x515   :  { %v1654_v33 = vpop.f32.mrb[36].mxu0  ;;  %1666 = vmatprep.subr.bf16.mxu1 %v1006_v30 }
 0x516   :  { %v958_v34 = vpop.f32.mrb[37].mxu0 }
 0x517   :  { %v1655_v26 = vpop.f32.mrb[38].mxu0 }
 0x518   :  { %v1008_v35 = vpack.c.bf16 %v1655_v26, %v1654_v33  ;;  %v961_v16 = vpop.f32.mrb[39].mxu0  ;;  %1667 = vmatpush3.bf16.msra.mxu1 %v1006_v30 }
 0x519   :  { %v1007_v36 = vpack.c.bf16 %v961_v16, %v958_v34 }
 0x51b   :  { %1668 = vmatprep.subr.bf16.mxu1 %v1007_v36 }
 0x51c   :  { %1669 = vmatpush3.bf16.msra.mxu1 %v1007_v36 }
 0x51d   :  { %v1658_v37 = vpop.f32.mrb[40].mxu0  ;;  %1670 = vmatprep.subr.bf16.mxu1 %v1008_v35 }
 0x51e   :  { %v974_v38 = vpop.f32.mrb[41].mxu0 }
 0x51f   :  { %v1659_v39 = vpop.f32.mrb[42].mxu0 }
 0x520   :  { %v1010_v40 = vpack.c.bf16 %v1659_v39, %v1658_v37  ;;  %v977_v41 = vpop.f32.mrb[43].mxu0  ;;  %1671 = vmatpush3.bf16.msra.mxu1 %v1008_v35 }
 0x521   :  { %v1009_v42 = vpack.c.bf16 %v977_v41, %v974_v38 }
 0x523   :  { %1672 = vmatprep.subr.bf16.mxu1 %v1009_v42 }
 0x524   :  { %1673 = vmatpush3.bf16.msra.mxu1 %v1009_v42 }
 0x525   :  { %v1662_v43 = vpop.f32.mrb[44].mxu0  ;;  %1674 = vmatprep.subr.bf16.mxu1 %v1010_v40 }
 0x526   :  { %v990_v44 = vpop.f32.mrb[45].mxu0 }
 0x527   :  { %v1663_v45 = vpop.f32.mrb[46].mxu0 }
 0x528   :  { %v1012_v46 = vpack.c.bf16 %v1663_v45, %v1662_v43  ;;  %v993_v54 = vpop.f32.mrb[47].mxu0  ;;  %1675 = vmatpush3.bf16.msra.mxu1 %v1010_v40 }
 0x529   :  { %v1011_v55 = vpack.c.bf16 %v993_v54, %v990_v44 }
 0x52b   :  { %1676 = vmatprep.subr.bf16.mxu1 %v1011_v55 }
 0x52c   :  { %1677 = vmatpush3.bf16.msra.mxu1 %v1011_v55 }
 0x52d   :  { %1678 = vmatprep.subr.bf16.mxu1 %v1012_v46 }
 0x530   :  { %1679 = vmatpush3.bf16.msra.mxu1 %v1012_v46 }
 0x531   :  { %1716 = vmatprep.subr.bf16.mxu1 %v1951_v57 }
 0x533   :  { %1681 = vmatmul.mubr.bf16.vlgmr.msra.gmra.mrb[32].mxu1 %v2127_v47  ;;  %v1787_v47 = vld [vmem:[#allocation10] sm:$0xff]  }
 0x534   :  { %1684 = vmatprep.mubr.bf16.mxu1 %v2129_v48  ;;  %1717 = vmatpush3.bf16.msra.mxu1 %v1787_v47  ;;  %v1788_v48 = vld [vmem:[#allocation10 + $0x8] sm:$0xff]  }
 0x535   :  { %1718 = vmatprep.subr.bf16.mxu1 %v1951_v57 }
 0x538   :  { %1719 = vmatpush3.bf16.msra.mxu1 %v1788_v48  ;;  %v1786_v48 = vld [vmem:[%s2211_s8] sm:$0xff]  }
 0x539   :  { %1720 = vmatprep.subr.bf16.mxu1 %v1951_v57 }
 0x53b   :  { %1685 = vmatmul.mubr.bf16.gmra.mrb[36].mxu1 %v2133_v49  ;;  %v1789_v49 = vld [vmem:[#allocation10 + $0x10] sm:$0xff]  }
 0x53c   :  { %1688 = vmatprep.mubr.bf16.mxu1 %v2135_v50  ;;  %1721 = vmatpush3.bf16.msra.mxu1 %v1789_v49  ;;  %v1790_v50 = vld [vmem:[#allocation10 + $0x18] sm:$0xff]  }
 0x53d   :  { %1722 = vmatprep.subr.bf16.mxu1 %v1951_v57  ;;  %v1794_v49 = vld [vmem:[#allocation10 + $0x38] sm:$0xff]  }
 0x540   :  { %1723 = vmatpush3.bf16.msra.mxu1 %v1790_v50 }
 0x541   :  { %1724 = vmatprep.subr.bf16.mxu1 %v1951_v57 }
 0x543   :  { %1689 = vmatmul.mubr.bf16.gmra.mrb[40].mxu1 %v2139_v51  ;;  %v1791_v51 = vld [vmem:[#allocation10 + $0x20] sm:$0xff]  }
 0x544   :  { %1692 = vmatprep.mubr.bf16.mxu1 %v2141_v52  ;;  %1725 = vmatpush3.bf16.msra.mxu1 %v1791_v51  ;;  %v1792_v52 = vld [vmem:[#allocation10 + $0x28] sm:$0xff]  }
 0x545   :  { %1726 = vmatprep.subr.bf16.mxu1 %v1951_v57 }
 0x548   :  { %1727 = vmatpush3.bf16.msra.mxu1 %v1792_v52 }
 0x549   :  { %1728 = vmatprep.subr.bf16.mxu1 %v1951_v57 }
 0x54b   :  { %1693 = vmatmul.mubr.bf16.gmra.mrb[44].mxu1 %v2145_v53  ;;  %v1793_v53 = vld [vmem:[#allocation10 + $0x30] sm:$0xff]  }
 0x54c   :  { %1732 = vmatprep.mubr.msk.bf16.mxu1 %vm1952_vm0, %v1951_v57  ;;  %1729 = vmatpush3.bf16.msra.mxu1 %v1793_v53 }
 0x54d   :  { %1730 = vmatprep.subr.bf16.mxu1 %v1951_v57 }
 0x550   :  { %1731 = vmatpush3.bf16.msra.mxu1 %v1794_v49 }
 0x606   :  { %v1682_v59 = vpop.f32.mrb[32].mxu1 }
 0x607   :  { %v1062_v60 = vadd.f32 %v1682_v59, %v1379_v58  ;;  %v1053_v61 = vpop.f32.mrb[33].mxu1  ;;  %v1302_v59 = vlaneseq }
 0x608   :  { %v1054_v56 = vadd.f32 %v1379_v58, %v1053_v61  ;;  %v1683_v62 = vpop.f32.mrb[34].mxu1 }
 0x609   :  { %v1065_v63 = vadd.f32 %v1683_v62, %v1379_v58  ;;  %v1056_v0 = vpop.f32.mrb[35].mxu1  ;;  %v1118_v2 = vmax.f32 %v1062_v60, 0.0  ;;  %v1303_v60 = vand.u32 127, %v1302_v59 }
 0x60a   :  { %v1057_v1 = vadd.f32 %v1379_v58, %v1056_v0  ;;  %v1116_v4 = vmax.f32 %v1054_v56, 0.0 }
 0x60b   :  { %v1119_v3 = vmax.f32 %v1065_v63, 0.0  ;;  %vm1304_vm1 = vcmp.lt.s32.totalorder %v1303_v60, 4 }
 0x60c   :  { %v1117_v5 = vmax.f32 %v1057_v1, 0.0 }
 0x60d   :  { %v1133_v6 = vpack.c.bf16 %v1119_v3, %v1118_v2 }
 0x60e   :  { %v1132_v7 = vpack.c.bf16 %v1117_v5, %v1116_v4  ;;  %v1686_v8 = vpop.f32.mrb[36].mxu1 }
 0x60f   :  { %v1078_v9 = vadd.f32 %v1686_v8, %v1379_v58  ;;  %v1069_v10 = vpop.f32.mrb[37].mxu1 }
 0x610   :  { %v1070_v11 = vadd.f32 %v1379_v58, %v1069_v10  ;;  %v1687_v12 = vpop.f32.mrb[38].mxu1  ;;  %1697 = vmatpush3.bf16.msra.mxu0 %v1132_v7 }
 0x611   :  { %v1081_v13 = vadd.f32 %v1687_v12, %v1379_v58  ;;  %v1072_v14 = vpop.f32.mrb[39].mxu1  ;;  %1698 = vmatprep.subr.bf16.mxu0 %v1951_v57  ;;  %v1122_v17 = vmax.f32 %v1078_v9, 0.0 }
 0x612   :  { %v1073_v15 = vadd.f32 %v1379_v58, %v1072_v14  ;;  %v1120_v19 = vmax.f32 %v1070_v11, 0.0 }
 0x613   :  { %v1123_v18 = vmax.f32 %v1081_v13, 0.0 }
 0x614   :  { %v1121_v20 = vmax.f32 %v1073_v15, 0.0  ;;  %1699 = vmatpush3.bf16.msra.mxu0 %v1133_v6 }
 0x615   :  { %v1135_v21 = vpack.c.bf16 %v1123_v18, %v1122_v17  ;;  %1700 = vmatprep.subr.bf16.mxu0 %v1951_v57 }
 0x616   :  { %v1134_v22 = vpack.c.bf16 %v1121_v20, %v1120_v19  ;;  %v1690_v23 = vpop.f32.mrb[40].mxu1 }
 0x617   :  { %v1094_v24 = vadd.f32 %v1690_v23, %v1379_v58  ;;  %v1085_v25 = vpop.f32.mrb[41].mxu1 }
 0x618   :  { %v1086_v27 = vadd.f32 %v1379_v58, %v1085_v25  ;;  %v1691_v28 = vpop.f32.mrb[42].mxu1  ;;  %1701 = vmatpush3.bf16.msra.mxu0 %v1134_v22 }
 0x619   :  { %v1097_v29 = vadd.f32 %v1691_v28, %v1379_v58  ;;  %v1088_v30 = vpop.f32.mrb[43].mxu1  ;;  %1702 = vmatprep.subr.bf16.mxu0 %v1951_v57  ;;  %v1126_v32 = vmax.f32 %v1094_v24, 0.0 }
 0x61a   :  { %v1089_v31 = vadd.f32 %v1379_v58, %v1088_v30  ;;  %v1124_v34 = vmax.f32 %v1086_v27, 0.0 }
 0x61b   :  { %v1127_v33 = vmax.f32 %v1097_v29, 0.0 }
 0x61c   :  { %v1125_v26 = vmax.f32 %v1089_v31, 0.0  ;;  %1703 = vmatpush3.bf16.msra.mxu0 %v1135_v21 }
 0x61d   :  { %v1137_v35 = vpack.c.bf16 %v1127_v33, %v1126_v32  ;;  %1704 = vmatprep.subr.bf16.mxu0 %v1951_v57 }
 0x61e   :  { %v1136_v16 = vpack.c.bf16 %v1125_v26, %v1124_v34  ;;  %v1694_v36 = vpop.f32.mrb[44].mxu1 }
 0x61f   :  { %v1110_v37 = vadd.f32 %v1694_v36, %v1379_v58  ;;  %v1101_v38 = vpop.f32.mrb[45].mxu1 }
 0x620   :  { %v1102_v39 = vadd.f32 %v1379_v58, %v1101_v38  ;;  %v1695_v40 = vpop.f32.mrb[46].mxu1  ;;  %1705 = vmatpush3.bf16.msra.mxu0 %v1136_v16 }
 0x621   :  { %v1113_v41 = vadd.f32 %v1695_v40, %v1379_v58  ;;  %v1104_v42 = vpop.f32.mrb[47].mxu1  ;;  %1706 = vmatprep.subr.bf16.mxu0 %v1951_v57  ;;  %v1130_v44 = vmax.f32 %v1110_v37, 0.0 }
 0x622   :  { %v1105_v43 = vadd.f32 %v1379_v58, %v1104_v42  ;;  %v1128_v46 = vmax.f32 %v1102_v39, 0.0 }
 0x623   :  { %v1131_v45 = vmax.f32 %v1113_v41, 0.0 }
 0x624   :  { %v1129_v54 = vmax.f32 %v1105_v43, 0.0  ;;  %1707 = vmatpush3.bf16.msra.mxu0 %v1137_v35 }
 0x625   :  { %v1139_v55 = vpack.c.bf16 %v1131_v45, %v1130_v44  ;;  %1708 = vmatprep.subr.bf16.mxu0 %v1951_v57 }
 0x626   :  { %v1138_v47 = vpack.c.bf16 %v1129_v54, %v1128_v46 }
 0x628   :  { %1709 = vmatpush3.bf16.msra.mxu0 %v1138_v47 }
 0x629   :  { %1710 = vmatprep.subr.bf16.mxu0 %v1951_v57  ;;  %v1381_v57 = vld [vmem:[%s2213_s10] ss:$0 sm:$0xff] }
 0x62c   :  { %1711 = vmatpush3.bf16.msra.mxu0 %v1139_v55 }
 0x62f   :  { %1713 = vmatmul.mubr.bf16.vlgmr.msra.gmra.mrb[48].mxu0 %v1786_v48 }
 0x702   :  { %v1199_v50 = vpop.f32.mrb[48].mxu0 }
 0x703   :  { %v1714_v51 = vpop.f32.mrb[49].mxu0 }
 0x704   :  { %v1202_v52 = vpop.f32.mrb[50].mxu0 }
 0x705   :  { %v1206_v53 = vpack.c.bf16 %v1202_v52, %v1199_v50  ;;  %v1715_v58 = vpop.f32.mrb[51].mxu0 }
 0x707   :  { %1733 = vmatmul.mubr.bf16.vlgmr.msra.gmra.mrb[48].mxu1 %v1206_v53 }
 0x7da   :  { %v1295_v61 = vpop.f32.mrb[48].mxu1 }
 0x7db   :  { %v1296_v56 = vadd.f32 %v1381_v57, %v1295_v61  ;;  %v1734_v62 = vpop.f32.mrb[49].mxu1 }
 0x7dc   :  { %v1298_v63 = vpop.f32.mrb[50].mxu1 }
 0x7dd   :  { %v1299_v0 = vadd.f32 %v1381_v57, %v1298_v63  ;;  %v1735_v1 = vpop.f32.mrb[51].mxu1  ;;  %v1305_v2 = vsel %vm1304_vm1, %v1296_v56, -1e+30 }
 0x7de   :  { %1307 = vmax.xlane.f32.xlu0 %v1305_v2 }
 0x7df   :  { %v1306_v3 = vsel %vm1304_vm1, %v1299_v0, -1e+30 }
 0x7e2   :  { %1309 = vmax.xlane.f32.xlu0 %v1306_v3 }
 0x86b   :  { %v1308_v4 = vpop.xlane.xlu0 %1307 }
 0x86c   :  { %v1311_v5 = vsub.f32 %v1305_v2, %v1308_v4 }
 0x86e   :  { %v1313_v6 = vmul.f32 1.442695, %v1311_v5 }
 0x86f   :  { %v1310_v7 = vpop.xlane.xlu0 %1309 }
 0x870   :  { %v1312_v8 = vsub.f32 %v1306_v3, %v1310_v7  ;;  %1795 = vpow2.f32 %v1313_v6 }
 0x872   :  { %v1315_v9 = vmul.f32 1.442695, %v1312_v8 }
 0x874   :  { %1797 = vpow2.f32 %v1315_v9 }
 0x87a   :  { %v1796_v10 = vpop.eup %1795 }
 0x87b   :  { %1317 = vadd.xlane.f32.xlu1 %v1796_v10 }
 0x87e   :  { %v1798_v11 = vpop.eup %1797 }
 0x87f   :  { %1319 = vadd.xlane.f32.xlu1 %v1798_v11 }
 0x908   :  { %v1318_v12 = vpop.xlane.xlu1 %1317 }
 0x909   :  { %1799 = vlog2.f32 %v1318_v12 }
 0x90c   :  { %v1320_v13 = vpop.xlane.xlu1 %1319 }
 0x90d   :  { %1801 = vlog2.f32 %v1320_v13 }
 0x913   :  { %v1800_v14 = vpop.eup %1799 }
 0x914   :  { %v1322_v15 = vmul.f32 0.6931472, %v1800_v14 }
 0x916   :  { %v1325_v17 = vsub.f32 %v1311_v5, %v1322_v15 }
 0x917   :  { %v1802_v18 = vpop.eup %1801 }
 0x918   :  { %1327 = vst [vmem:[%s2214_s11] sm:$0xff] %v1325_v17  ;;  %v1324_v19 = vmul.f32 0.6931472, %v1802_v18 }
 0x91a   :  { %v1326_v20 = vsub.f32 %v1312_v8, %v1324_v19 }
 0x91c   :  { %1328 = vst [vmem:[%s2214_s11 + $0x8] sm:$0xff] %v1326_v20 }
 0x91d   :  { %1333 = vsyncpa [#allocation3], 1 }
 0x91e   :  { %1334 = vsyncpa [#allocation5], 1 }
 0x91f   :  { %1335 = vsyncpa [#allocation8], 1 }
 0x920   :  { %1336 = vsyncpa [#allocation11], 1 }

</bundles_post_ra>
